<compile_context>
chip_gen: v5e
topology: v5e:2x2
jax: 0.10.0
libtpu: 0.0.40
codegen_flags: <defaults>
</compile_context>

<pallas_src>
import jax
import jax.numpy as jnp
from jax.experimental import pallas as pl
from jax.experimental.pallas import tpu as pltpu

LANE = 128
SUBLANE = 8
# Below this many complex elements, use the plain-XLA fallback.
SMALL_FALLBACK_L = 8192
# Ragged-path sizing: useful elements per channel per step and an approximate
# per-step VMEM budget (all double buffers, incl. sublane/lane padding of the
# channel-interleaved input blocks).
RAGGED_TARGET_ELEMS = 128 * 1024
RAGGED_VMEM_BUDGET = 16 << 20


def _prod_cmp_kernel(a_ref, b_ref, o_ref):
    # a_ref, b_ref: (tile_n, 2, ...) ; o_ref: (2, tile_n, ...)
    # Ref slices are free views; keep the VPU stream load -> fma -> store.
    ar = a_ref[:, 0]
    ai = a_ref[:, 1]
    br = b_ref[:, 0]
    bi = b_ref[:, 1]
    o_ref[0] = (ar * br - ai * bi).astype(o_ref.dtype)   # real
    o_ref[1] = (ai * br + ar * bi).astype(o_ref.dtype)   # imag


def _tile_params():
    """Chip-generation-aware tile sizing (rows of 128 lanes per step)."""
    rows = 2048              # ~12 MiB/step double buffered: safe on v5e/v6e/v7x
    vmem_limit = 40 << 20
    try:
        cap = pltpu.get_tpu_info().vmem_capacity_bytes
        if cap >= (96 << 20):        # v5e / v6e: 128 MiB physical VMEM
            rows = 4096              # ~24 MiB/step
            vmem_limit = 64 << 20
        else:                        # v7x: 64 MiB per TensorCore -> headroom
            rows = 2048
            vmem_limit = min(40 << 20, max(32 << 20, cap // 2))
    except Exception:                # info unavailable: conservative defaults
        pass
    return rows, vmem_limit


def _cost(L, itemsize):
    return pl.CostEstimate(flops=6 * L, transcendentals=0,
                           bytes_accessed=6 * L * itemsize)


def _prod_cmp_aligned(a3, b3, N, HW, out_dtype, target_rows, vmem_limit):
    """HW % 128 == 0: dense (N,2,R,128) blocks, no padding anywhere."""
    R = HW // LANE
    a4 = a3.reshape(N, 2, R, LANE)   # free view
    b4 = b3.reshape(N, 2, R, LANE)

    if R >= target_rows:
        tile_r = target_rows         # multiple of 8 -> valid sublane tiling
        tile_n = 1
    else:
        tile_r = R                   # == full dim -> always valid
        tile_n = min(N, max(1, target_rows // R))

    grid_n = pl.cdiv(N, tile_n)
    grid_r = pl.cdiv(R, tile_r)
    # Guarantee >= 2 grid steps so both v7x TensorCores get work.
    if grid_n * grid_r == 1:
        if N >= 2:
            tile_n = (N + 1) // 2
            grid_n = pl.cdiv(N, tile_n)
        elif R >= 2 * SUBLANE:
            tile_r = (((R + 1) // 2 + SUBLANE - 1) // SUBLANE) * SUBLANE
            grid_r = pl.cdiv(R, tile_r)

    in_spec = pl.BlockSpec((tile_n, 2, tile_r, LANE),
                           lambda ni, ri: (ni, 0, ri, 0))
    out_spec = pl.BlockSpec((2, tile_n, tile_r, LANE),
                            lambda ni, ri: (0, ni, ri, 0))

    out4 = pl.pallas_call(
        _prod_cmp_kernel,
        grid=(grid_n, grid_r),
        in_specs=[in_spec, in_spec],
        out_specs=out_spec,
        out_shape=jax.ShapeDtypeStruct((2, N, R, LANE), out_dtype),
        compiler_params=pltpu.CompilerParams(
            dimension_semantics=("parallel", "parallel"),
            vmem_limit_bytes=vmem_limit),
        cost_estimate=_cost(N * HW, jnp.dtype(out_dtype).itemsize),
    )(a4, b4)
    return out4.reshape(2, N * HW)   # free view


def _prod_cmp_ragged(a3, b3, N, HW, out_dtype, vmem_limit):
    """HW % 128 != 0: tile (N,2,HW) directly; ragged last block is masked."""
    itemsize = jnp.dtype(out_dtype).itemsize
    tile_n_min = N if N <= SUBLANE else SUBLANE
    max_phw = (RAGGED_VMEM_BUDGET // (36 * tile_n_min * itemsize) // LANE) * LANE
    max_phw = max(LANE, max_phw)

    if HW < LANE:
        tile_hw = HW                                   # == full dim
    else:
        # multiple of 128 and <= HW -> last hw block is the (masked) ragged one
        tile_hw = min((HW // LANE) * LANE, max_phw, RAGGED_TARGET_ELEMS)

    padded_hw = ((tile_hw + LANE - 1) // LANE) * LANE
    if N <= SUBLANE:
        tile_n = N                                     # == full dim
    else:
        want = max(SUBLANE, RAGGED_TARGET_ELEMS // tile_hw)
        cap = max(SUBLANE, RAGGED_VMEM_BUDGET // (36 * padded_hw * itemsize))
        tile_n = max(SUBLANE, (min(want, cap, N) // SUBLANE) * SUBLANE)

    grid = (pl.cdiv(N, tile_n), pl.cdiv(HW, tile_hw))
    in_spec = pl.BlockSpec((tile_n, 2, tile_hw), lambda ni, hi: (ni, 0, hi))
    out_spec = pl.BlockSpec((2, tile_n, tile_hw), lambda ni, hi: (0, ni, hi))

    out3 = pl.pallas_call(
        _prod_cmp_kernel,
        grid=grid,
        in_specs=[in_spec, in_spec],
        out_specs=out_spec,
        out_shape=jax.ShapeDtypeStruct((2, N, HW), out_dtype),
        compiler_params=pltpu.CompilerParams(
            dimension_semantics=("parallel", "parallel"),
            vmem_limit_bytes=vmem_limit),
        cost_estimate=_cost(N * HW, itemsize),
    )(a3, b3)
    return out3.reshape(2, N * HW)   # free view


def prod_cmp(inp1, inp2):
    """JAX/Pallas equivalent of Prod_cmp.forward.

    inp1, inp2: arrays of shape (N, 2, ...) with matching shapes.
    Returns array of shape (1, 2, L) with L = N * prod(trailing dims).
    """
    assert inp1.shape == inp2.shape
    assert inp1.ndim >= 2 and inp1.shape[1] == 2, "axis 1 must be size 2 (real/imag)"

    N = inp1.shape[0]
    HW = 1
    for d in inp1.shape[2:]:
        HW *= d
    L = N * HW
    out_dtype = jnp.result_type(inp1.dtype, inp2.dtype)

    a3 = inp1.reshape(N, 2, HW)      # free views
    b3 = inp2.reshape(N, 2, HW)

    if L < SMALL_FALLBACK_L:
        # Tiny inputs: pallas_call dispatch + per-step overhead dominates.
        ar, ai = a3[:, 0], a3[:, 1]
        br, bi = b3[:, 0], b3[:, 1]
        real = (ar * br - ai * bi).astype(out_dtype).reshape(1, 1, L)
        imag = (ai * br + ar * bi).astype(out_dtype).reshape(1, 1, L)
        return jnp.concatenate([real, imag], axis=1)

    target_rows, vmem_limit = _tile_params()
    if HW % LANE == 0:
        out2 = _prod_cmp_aligned(a3, b3, N, HW, out_dtype, target_rows, vmem_limit)
    else:
        out2 = _prod_cmp_ragged(a3, b3, N, HW, out_dtype, vmem_limit)
    return out2[None, :, :]          # (1, 2, L)


def _reference(inp1, inp2):
    r1 = inp1[:, 0].reshape(1, 1, -1) * inp2[:, 0].reshape(1, 1, -1)
    r2 = inp1[:, 1].reshape(1, 1, -1) * inp2[:, 1].reshape(1, 1, -1)
    i1 = inp1[:, 1].reshape(1, 1, -1) * inp2[:, 0].reshape(1, 1, -1)
    i2 = inp1[:, 0].reshape(1, 1, -1) * inp2[:, 1].reshape(1, 1, -1)
    return jnp.concatenate([r1 - r2, i1 + i2], axis=1)


if __name__ == "__main__":
    cases = [
        ("fallback-aligned", (2, 2, 16, 16)),    # small -> XLA fallback
        ("fallback-ragged", (2, 2, 5, 7)),       # small -> XLA fallback
        ("kernel-aligned", (2, 2, 64, 64)),      # HW % 128 == 0 kernel path
        ("kernel-ragged", (2, 2, 72, 72)),       # ragged HW, masked tail
        ("kernel-ragged-bigN", (16, 2, 40, 40)),  # ragged HW, N > 8 tiling
    ]
    key = jax.random.PRNGKey(0)
    for name, shape in cases:
        key, k1, k2 = jax.random.split(key, 3)
        x = jax.random.normal(k1, shape, dtype=jnp.float32)
        y = jax.random.normal(k2, shape, dtype=jnp.float32)
        out = jax.block_until_ready(prod_cmp(x, y))
        ref = _reference(x, y)
        L = shape[0] * shape[2] * shape[3]
        assert out.shape == (1, 2, L), (name, out.shape)
        assert jnp.allclose(out, ref, atol=1e-5, rtol=1e-5), f"mismatch vs reference: {name}"
    print("KERNEL_OK")
</pallas_src>

<mosaic_0001>
module attributes {stable_mosaic.version = 11 : i64} {
  func.func @_prod_cmp_kernel(%arg0: i32, %arg1: i32, %arg2: memref<1x2x32x128xf32, #tpu.memory_space<vmem>>, %arg3: memref<1x2x32x128xf32, #tpu.memory_space<vmem>>, %arg4: memref<2x1x32x128xf32, #tpu.memory_space<vmem>>) attributes {dimension_semantics = [#tpu.dimension_semantics<parallel>, #tpu.dimension_semantics<parallel>], iteration_bounds = array<i64: 2, 1>, scalar_prefetch = 0 : i64, scratch_operands = 0 : i64, tpu.core_type = #tpu.core_type<tc>, window_params = [{transform_indices = @transform_0, window_bounds = array<i64: 1, 2, 32, 128>}, {transform_indices = @transform_1, window_bounds = array<i64: 1, 2, 32, 128>}, {transform_indices = @transform_2, window_bounds = array<i64: 2, 1, 32, 128>}]} {
    %c0 = arith.constant 0 : index
    %c0_0 = arith.constant 0 : index
    %c0_1 = arith.constant 0 : index
    %c0_2 = arith.constant 0 : index
    %0 = vector.load %arg2[%c0, %c0_0, %c0_1, %c0_2] : memref<1x2x32x128xf32, #tpu.memory_space<vmem>>, vector<1x1x32x128xf32>
    %1 = vector.shape_cast %0 : vector<1x1x32x128xf32> to vector<1x32x128xf32>
    %c0_3 = arith.constant 0 : index
    %c1 = arith.constant 1 : index
    %c0_4 = arith.constant 0 : index
    %c0_5 = arith.constant 0 : index
    %2 = vector.load %arg2[%c0_3, %c1, %c0_4, %c0_5] : memref<1x2x32x128xf32, #tpu.memory_space<vmem>>, vector<1x1x32x128xf32>
    %3 = vector.shape_cast %2 : vector<1x1x32x128xf32> to vector<1x32x128xf32>
    %c0_6 = arith.constant 0 : index
    %c0_7 = arith.constant 0 : index
    %c0_8 = arith.constant 0 : index
    %c0_9 = arith.constant 0 : index
    %4 = vector.load %arg3[%c0_6, %c0_7, %c0_8, %c0_9] : memref<1x2x32x128xf32, #tpu.memory_space<vmem>>, vector<1x1x32x128xf32>
    %5 = vector.shape_cast %4 : vector<1x1x32x128xf32> to vector<1x32x128xf32>
    %c0_10 = arith.constant 0 : index
    %c1_11 = arith.constant 1 : index
    %c0_12 = arith.constant 0 : index
    %c0_13 = arith.constant 0 : index
    %6 = vector.load %arg3[%c0_10, %c1_11, %c0_12, %c0_13] : memref<1x2x32x128xf32, #tpu.memory_space<vmem>>, vector<1x1x32x128xf32>
    %7 = vector.shape_cast %6 : vector<1x1x32x128xf32> to vector<1x32x128xf32>
    %8 = arith.mulf %1, %5 : vector<1x32x128xf32>
    %9 = arith.mulf %3, %7 : vector<1x32x128xf32>
    %10 = arith.subf %8, %9 : vector<1x32x128xf32>
    %c0_14 = arith.constant 0 : index
    %c0_15 = arith.constant 0 : index
    %c0_16 = arith.constant 0 : index
    %c0_17 = arith.constant 0 : index
    %11 = vector.load %arg4[%c0_14, %c0_15, %c0_16, %c0_17] : memref<2x1x32x128xf32, #tpu.memory_space<vmem>>, vector<1x1x32x128xf32>
    %12 = vector.shape_cast %11 : vector<1x1x32x128xf32> to vector<1x32x128xf32>
    %13 = vector.shape_cast %10 : vector<1x32x128xf32> to vector<1x1x32x128xf32>
    tpu.vector_store %arg4[%c0_14, %c0_15, %c0_16, %c0_17], %13 {strides = array<i32>} : memref<2x1x32x128xf32, #tpu.memory_space<vmem>>, vector<1x1x32x128xf32>,
    %14 = arith.mulf %3, %5 : vector<1x32x128xf32>
    %15 = arith.mulf %1, %7 : vector<1x32x128xf32>
    %16 = arith.addf %14, %15 : vector<1x32x128xf32>
    %c1_18 = arith.constant 1 : index
    %c0_19 = arith.constant 0 : index
    %c0_20 = arith.constant 0 : index
    %c0_21 = arith.constant 0 : index
    %17 = vector.load %arg4[%c1_18, %c0_19, %c0_20, %c0_21] : memref<2x1x32x128xf32, #tpu.memory_space<vmem>>, vector<1x1x32x128xf32>
    %18 = vector.shape_cast %17 : vector<1x1x32x128xf32> to vector<1x32x128xf32>
    %19 = vector.shape_cast %16 : vector<1x32x128xf32> to vector<1x1x32x128xf32>
    tpu.vector_store %arg4[%c1_18, %c0_19, %c0_20, %c0_21], %19 {strides = array<i32>} : memref<2x1x32x128xf32, #tpu.memory_space<vmem>>, vector<1x1x32x128xf32>,
    return
  }
  func.func @transform_0(%arg0: i32, %arg1: i32) -> (i32, i32, i32, i32) {
    %c0_i32 = arith.constant 0 : i32
    %c0_i32_0 = arith.constant 0 : i32
    %c0_i32_1 = arith.constant 0 : i32
    return %arg0, %c0_i32, %arg1, %c0_i32_0 : i32, i32, i32, i32
  }
  func.func @transform_1(%arg0: i32, %arg1: i32) -> (i32, i32, i32, i32) {
    %c0_i32 = arith.constant 0 : i32
    %c0_i32_0 = arith.constant 0 : i32
    %c0_i32_1 = arith.constant 0 : i32
    return %arg0, %c0_i32, %arg1, %c0_i32_0 : i32, i32, i32, i32
  }
  func.func @transform_2(%arg0: i32, %arg1: i32) -> (i32, i32, i32, i32) {
    %c0_i32 = arith.constant 0 : i32
    %c0_i32_0 = arith.constant 0 : i32
    %c0_i32_1 = arith.constant 0 : i32
    return %c0_i32, %arg0, %arg1, %c0_i32_0 : i32, i32, i32, i32
  }
}

</mosaic_0001>

<bundles_post_ra>
// kernel: tpu_custom_call.1
= control target key start
LH: loop header
LB: loop body
LE: loop exit
PB: predicated region body
PF: predicated region fallthrough
CT: control target
= control target key end

     0   :  { %7 = vsyncpa [#allocation3], 0  ;;  %s856_s0 = inlined_call_operand.hbm [shape: f32[2,2,32,128], index: 0, kind: input, shape index: {}]   ;;  %s857_s1 = inlined_call_operand.hbm [shape: f32[2,2,32,128], index: 1, kind: input, shape index: {}]   ;;  %s858_s2 = inlined_call_operand.hbm [shape: f32[2,2,32,128], index: 2, kind: output, shape index: {}]  }
   0x1   :  { %9 = vsyncpa [#allocation3 + $0x1], 0 }
   0x2   :  { %10 = vsyncpa [#allocation6], 0 }
   0x3   :  { %12 = vsyncpa [#allocation6 + $0x1], 0 }
   0x4   :  { %13 = vsyncpa [#allocation4], 0 }
   0x5   :  { %15 = vsyncpa [#allocation4 + $0x1], 0  ;;  %s696_s9 = smov 0   ;;  %s698_s10 = smov 0  }
   0x6   :  { %s700_s11 = smov 0   ;;  %s702_s12 = smov 0  }
   0x7   :  { %s704_s13 = smov 0   ;;  %s706_s14 = smov 0  }
   0x8 LB: > { %s436_s15 = sadd.s32 4294967295, %s670_s14   ;;  %s437_s16 = sadd.s32 4294967294, %s670_s14   ;;  %s670_s14 = sphi %s706_s14, %s21_s14   ;;  %s666_s13 = sphi %s704_s13, %s868_s13   ;;  %s662_s12 = sphi %s702_s12, %s867_s12   ;;  %s658_s11 = sphi %s700_s11, %s866_s11   ;;  %s654_s10 = sphi %s698_s10, %s865_s10   ;;  %s650_s9 = sphi %s696_s9, %s864_s9  }
   0x9   : > { %s33_s17 = sadd.s32 1, %s666_s13  ;;  %s42_s18 = sadd.s32 1, %s658_s11 }
   0xa   : > { %p35_p0 = scmp.ge.s32.totalorder %s33_s17, 2  ;;  %p49_p1 = scmp.ne.s32.totalorder %s658_s11, %s654_s10 }
   0xb   : > { %p50_p2 = scmp.eq.s32.totalorder %s670_s14, 0  ;;  %p55_p3 = scmp.ne.s32.totalorder %s654_s10, %s650_s9 }
   0xc   : > { %s870_s17 = smov (%p35_p0, %s33_s17), 0  ;;  %p56_p5 = scmp.eq.s32.totalorder %s436_s15, 0 }
   0xd   : > { %p737_p4 = por %p50_p2, %p49_p1  ;;  %s37_s20 = ssub.s32 %s666_s13, %s870_s17 }
   0xe   : > { %p109_p6 = scmp.eq.s32.totalorder %s436_s15, 1  ;;  %p40_p7 = scmp.eq.s32.totalorder %s37_s20, 0 }
   0xf   : > { %p743_p8 = por %p56_p5, %p55_p3  ;;  %p115_p10 = scmp.eq.s32.totalorder %s437_s16, 1 }
  0x10   : > { %p747_p9 = por %p109_p6, %p49_p1  ;;  %p439_p12 = scmp.ge.s32.totalorder %s670_s14, 2 }
  0x11   : > { %s752_s23 = scalar_select %p40_p7, %s658_s11, %s42_s18  }
  0x12   : > { %p754_p11 = por %p115_p10, %p55_p3  ;;  %p493_p13 = scmp.lt.s32.totalorder %s670_s14, 2 }
  0x13   : > { %s761_s25 = sand.u32 1, %s658_s11   ;;  %s467_s27 = sshll.u32 %s666_s13, 6 }
  0x14   : > { %s440_s26 = sshll.u32 %s761_s25, 6  ;;  %s146_s30 = scalar_lea.hbm %s856_s0, %s467_s27 }
  0x15   : > { %s139_s3 = scalar_lea.vmem [#allocation2], %s440_s26  ;;  %s147_s5 = sshll.u32 %s146_s30, 4  ;;  %s148_s5 = int_to_ptr.hbm [resolvable:$true] %s147_s5 }
  0x16   : > { %s149_s4 = sshll.u32 %s139_s3, 4  ;;  %p770_p0 = pnand %p493_p13, %p737_p4  ;;  %s150_s4 = int_to_ptr.vmem [resolvable:$true] %s149_s4 }
  0x17   : > { %p446_p1 = scmp.ge.s32.totalorder %s670_s14, 1  ;;  %s136_s7 = scalar_lea.sflag [#allocation3], %s761_s25 }
  0x18   : > { %s672_s8 = smov 128   ;;  %s673_s15 = smov 8  }
  0x19   : > { %485 = dma.hbm_to_vmem [thread:$0]  (!%p770_p0), %s148_s5, 1024, %s150_s4, %s136_s7, %s672_s8, %s672_s8, %s673_s15  }
  0x1a   : > { %p181_p2 = scmp.lt.s32.totalorder %s670_s14, 3  ;;  %s170_s20 = scalar_lea.hbm %s857_s1, %s467_s27 }
  0x1b   : > { %s171_s28 = sshll.u32 %s170_s20, 4  ;;  %s163_s19 = scalar_lea.vmem [#allocation5], %s440_s26  ;;  %s172_s28 = int_to_ptr.hbm [resolvable:$true] %s171_s28 }
  0x1c   : > { %p182_p3 = pnand %p446_p1, %p181_p2  ;;  %s173_s29 = sshll.u32 %s163_s19, 4  ;;  %s174_s29 = int_to_ptr.vmem [resolvable:$true] %s173_s29 }
  0x1d   : > { %s160_s30 = scalar_lea.sflag [#allocation6], %s761_s25  ;;  %s786_s3 = sand.u32 (!%p182_p3), 1, %s654_s10  }
  0x1e   : > { %488 = dma.hbm_to_vmem [thread:$0]  (!%p770_p0), %s172_s28, 1024, %s174_s29, %s160_s30, %s672_s8, %s672_s8, %s673_s15  }
  0x1f   : > { %185 = sbr.rel (%p182_p3) target bundleno = 65 (0x41), region = 28  ;;  %s789_s4 = sshll.u32 (!%p182_p3), %s786_s3, 6 }
  0x20   : > { %s188_s27 = scalar_lea.sflag (!%p182_p3), [#allocation3], %s786_s3  ;;  %s793_s5 = scalar_lea.vmem (!%p182_p3), [#allocation2], %s789_s4 }
  0x24   : > { %637 = dma.done.wait (%p743_p8), %s188_s27, 1024  }
  0x25   : > { %639 = vsyncadd (%p743_p8), %s188_s27, 4294966272  ;;  %s198_s25 = scalar_lea.sflag [#allocation6], %s786_s3  ;;  %s201_s26 = scalar_lea.vmem [#allocation5], %s789_s4 }
  0x26   : > { %641 = dma.done.wait (%p743_p8), %s198_s25, 1024  }
  0x27   : > { %643 = vsyncadd (%p743_p8), %s198_s25, 4294966272  ;;  %v231_v0 = vld [vmem:[%s793_s5] sm:$0xff]  ;;  %v232_v5 = vld [vmem:[%s793_s5 + $0x8] sm:$0xff]  ;;  %s227_s21 = scalar_lea.vmem [#allocation7], %s789_s4  ;;  %s283_s6 = scalar_lea.sflag [#allocation4], %s786_s3 }
  0x28   : > { %v450_v1 = vld [vmem:[%s793_s5 + $0x20] sm:$0xff]  ;;  %v451_v6 = vld [vmem:[%s793_s5 + $0x28] sm:$0xff]  ;;  %v233_v11 = vld [vmem:[%s793_s5 + $0x10] sm:$0xff] }
  0x29   : > { %v240_v2 = vld [vmem:[%s201_s26] sm:$0xff]  ;;  %v241_v9 = vld [vmem:[%s201_s26 + $0x8] sm:$0xff]  ;;  %v452_v15 = vld [vmem:[%s793_s5 + $0x30] sm:$0xff] }
  0x2a   : > { %v454_v3 = vld [vmem:[%s201_s26 + $0x20] sm:$0xff]  ;;  %v249_v4 = vmul.f32 %v240_v2, %v231_v0  ;;  %v265_v7 = vmul.f32 %v450_v1, %v240_v2  ;;  %v455_v10 = vld [vmem:[%s201_s26 + $0x28] sm:$0xff]  ;;  %v250_v13 = vmul.f32 %v241_v9, %v232_v5  ;;  %v242_v16 = vld [vmem:[%s201_s26 + $0x10] sm:$0xff]  ;;  %v266_v18 = vmul.f32 %v451_v6, %v241_v9 }
  0x2b   : > { %v253_v8 = vmul.f32 %v454_v3, %v450_v1  ;;  %v269_v12 = vmul.f32 %v454_v3, %v231_v0  ;;  %v254_v14 = vmul.f32 %v455_v10, %v451_v6  ;;  %v456_v17 = vld [vmem:[%s201_s26 + $0x30] sm:$0xff]  ;;  %v270_v19 = vmul.f32 %v455_v10, %v232_v5  ;;  %v234_v23 = vld [vmem:[%s793_s5 + $0x18] sm:$0xff] }
  0x2c   : > { %v251_v21 = vmul.f32 %v242_v16, %v233_v11  ;;  %v255_v22 = vmul.f32 %v456_v17, %v452_v15  ;;  %v453_v24 = vld [vmem:[%s793_s5 + $0x38] sm:$0xff]  ;;  %v267_v30 = vmul.f32 %v452_v15, %v242_v16  ;;  %v271_v33 = vmul.f32 %v456_v17, %v233_v11 }
  0x2d   : > { %v257_v20 = vsub.f32 %v249_v4, %v253_v8  ;;  %v243_v25 = vld [vmem:[%s201_s26 + $0x18] sm:$0xff]  ;;  %v258_v26 = vsub.f32 %v250_v13, %v254_v14  ;;  %v273_v29 = vadd.f32 %v269_v12, %v265_v7  ;;  %v274_v35 = vadd.f32 %v270_v19, %v266_v18 }
  0x2e   : > { %v457_v27 = vld [vmem:[%s201_s26 + $0x38] sm:$0xff]  ;;  %v252_v28 = vmul.f32 %v243_v25, %v234_v23  ;;  %v259_v31 = vsub.f32 %v251_v21, %v255_v22  ;;  %v268_v34 = vmul.f32 %v453_v24, %v243_v25  ;;  %v275_v38 = vadd.f32 %v271_v33, %v267_v30 }
  0x2f   : > { %261 = vst [vmem:[%s227_s21] sm:$0xff] %v257_v20  ;;  %v256_v32 = vmul.f32 %v457_v27, %v453_v24  ;;  %v272_v36 = vmul.f32 %v457_v27, %v234_v23 }
  0x30   : > { %262 = vst [vmem:[%s227_s21 + $0x8] sm:$0xff] %v258_v26 }
  0x31   : > { %263 = vst [vmem:[%s227_s21 + $0x10] sm:$0xff] %v259_v31  ;;  %v260_v37 = vsub.f32 %v252_v28, %v256_v32  ;;  %v276_v39 = vadd.f32 %v272_v36, %v268_v34 }
  0x32   : > { %458 = vst [vmem:[%s227_s21 + $0x20] sm:$0xff] %v273_v29 }
  0x33   : > { %264 = vst [vmem:[%s227_s21 + $0x18] sm:$0xff] %v260_v37 }
  0x34   : > { %459 = vst [vmem:[%s227_s21 + $0x28] sm:$0xff] %v274_v35 }
  0x35   : > { %460 = vst [vmem:[%s227_s21 + $0x30] sm:$0xff] %v275_v38 }
  0x36   : > { %461 = vst [vmem:[%s227_s21 + $0x38] sm:$0xff] %v276_v39 }
  0x37   : > { %s469_s7 = sshll.u32 %s662_s12, 5  ;;  %s307_s8 = sshll.u32 %s227_s21, 4  ;;  %s308_s8 = int_to_ptr.vmem [resolvable:$true] %s307_s8 }
  0x38   : > { %s296_s18 = scalar_lea.hbm %s858_s2, %s469_s7  ;;  %s674_s28 = smov 512  }
  0x39   : > { %s309_s20 = sshll.u32 %s296_s18, 4  ;;  %474 = sst [smem:[#allocation9]] (%p747_p9), %s674_s28  ;;  %s310_s20 = int_to_ptr.hbm [resolvable:$true] %s309_s20 }
  0x3a   : > { %s675_s19 = smov 1024   ;;  %s676_s29 = smov 4  }
  0x3b   : > { %475 = sst [smem:[#allocation9 + $0x1]] (%p747_p9), %s675_s19  ;;  %s677_s12 = smov 128  }
  0x3c   : > { %476 = sst [smem:[#allocation9 + $0x2]] (%p747_p9), %s676_s29  ;;  %s678_s30 = smov 8  }
  0x3d   : > { %477 = sst [smem:[#allocation9 + $0x3]] (%p747_p9), %s677_s12  ;;  %s679_s3 = smov [#allocation8]  }
  0x3e   : > { %478 = sst [smem:[#allocation9 + $0x4]] (%p747_p9), %s677_s12  ;;  %s680_s4 = smov 0  }
  0x3f   : > { %479 = sst [smem:[#allocation9 + $0x5]] (%p747_p9), %s678_s30 }
  0x40   : > { %480 = dma.general (%p747_p9), %s308_s8, 1024, %s310_s20, %s283_s6, %s679_s3, [#allocation9], %s680_s4, 0  }
  0x41 PF: > { %s337_s27 = sand.u32 1, %s650_s9   ;;  %p490_p4 = pnand %p439_p12, %p754_p11 }
  0x42   : > { %s338_s5 = scalar_lea.sflag [#allocation4], %s337_s27 }
  0x43   : > { %p491_p5 = pneg %p490_p4 }
  0x45   : > { %645 = dma.done.wait (%p491_p5), %s338_s5, 1024  }
  0x46   : > { %647 = vsyncadd (%p491_p5), %s338_s5, 4294966272  ;;  %s21_s14 = sadd.s32 1, %s670_s14   ;;  %s864_s9 = smov %s654_s10 }
  0x47   : > { %p18_p6 = scmp.ge.s32.totalorder %s21_s14, 4   ;;  %s865_s10 = smov %s658_s11 }
  0x48   : > { %s866_s11 = smov %s752_s23  ;;  %s867_s12 = smov %s666_s13 }
  0x49   : > { %s868_s13 = smov %s870_s17  ;;  %20 = sbr.rel (!%p18_p6) target bundleno = 8 (0x8), region = 94 }
  0x4e   :  { %344 = vsyncpa [#allocation3], 1 }
  0x4f   :  { %346 = vsyncpa [#allocation3 + $0x1], 1 }
  0x50   :  { %347 = vsyncpa [#allocation6], 1 }
  0x51   :  { %349 = vsyncpa [#allocation6 + $0x1], 1 }
  0x52   :  { %350 = vsyncpa [#allocation4], 1 }
  0x53   :  { %352 = vsyncpa [#allocation4 + $0x1], 1 }

</bundles_post_ra>
